<compile_context>
chip_gen: v7x
topology: tpu7x:2x2x1
jax: 0.10.0
libtpu: 0.0.40
codegen_flags: <defaults>
</compile_context>

<pallas_src>
import jax
import jax.numpy as jnp
from jax.experimental import pallas as pl
from jax.experimental.pallas import tpu as pltpu


LANE_TILE = 512       # lane (last-dim) width of every block; multiple of 128
MAX_ROW_BLOCK = 256   # sublane rows per block (256*512*2*4B = 1 MiB of x)
SMALL_N_MAX = 16384   # at or below this, use a single no-grid invocation


def linreg_kernel(w_ref, b_ref, x_ref, o_ref):
    # w_ref: SMEM [O*F] (row-major w), b_ref: SMEM [O]   -- scalar reads
    # x_ref: VMEM [F, R, C]   (x transposed + reshaped; lane/sublane dense)
    # o_ref: VMEM [O, R, C]
    F = x_ref.shape[0]
    O = o_ref.shape[0]
    for o in range(O):                                   # static (O == 1 here)
        # Hoist SMEM scalar reads out of the vector math.
        w_of = [w_ref[o * F + f] for f in range(F)]
        bias = b_ref[o]
        # Fold the bias into the first product: acc = x0*w0 + b, then += xf*wf.
        acc = x_ref[0, :, :] * w_of[0] + bias
        for f in range(1, F):                            # static (F == 2 here)
            acc = acc + x_ref[f, :, :] * w_of[f]
        o_ref[o, :, :] = acc.astype(o_ref.dtype)


def linear_regression(x, w, b):
    """y = x @ w.T + b   with x:[N,F], w:[O,F], b:[1,O]/[O,1] -> y:[N,O]."""
    N, F = x.shape
    O = w.shape[0]
    out_dtype = x.dtype

    x = jnp.asarray(x, jnp.float32)
    w_flat = jnp.asarray(w, jnp.float32).reshape(O * F)     # SMEM scalars
    b_flat = jnp.asarray(b, jnp.float32).reshape(O)

    cost = pl.CostEstimate(
        flops=2 * N * F * O,
        transcendentals=0,
        bytes_accessed=4 * (N * F + N * O + O * F + O),
    )
    smem = pl.BlockSpec(memory_space=pltpu.MemorySpace.SMEM)

    if N <= SMALL_N_MAX:
        # Tiny N: one invocation, full arrays in VMEM, no grid at all.
        # TODO(synk): at tiny N this standalone pallas_call is pure launch/DMA
        # overhead; in production this op should be fused into its caller.
        xt = x.T.reshape(F, 1, N)
        out = pl.pallas_call(
            linreg_kernel,
            out_shape=jax.ShapeDtypeStruct((O, 1, N), out_dtype),
            in_specs=[smem, smem,
                      pl.BlockSpec(memory_space=pltpu.MemorySpace.VMEM)],
            out_specs=pl.BlockSpec(memory_space=pltpu.MemorySpace.VMEM),
            cost_estimate=cost,
        )(w_flat, b_flat, xt)
        return out.reshape(O, N).T                          # bit-identical for O==1

    # ---- Large N: sublane/lane-dense 3-D tiling [F, rows, C], any N (ragged ok).
    C = LANE_TILE
    rows = pl.cdiv(N, C)
    r_blk = MAX_ROW_BLOCK
    # Keep at least 4 grid steps (>= 2 per TensorCore on v7x) so the pipeline
    # actually overlaps; otherwise prefer the biggest block.
    while r_blk > 8 and pl.cdiv(rows, r_blk) < 4:
        r_blk //= 2
    steps = pl.cdiv(rows, r_blk)
    rows_pad = steps * r_blk
    n_pad = rows_pad * C

    # TODO(synk): this pad+transpose is one extra HBM pass over x; in production
    # the producer should emit x as [F, N] (or this op should be fused into its
    # caller) so the kernel streams x straight from its natural layout.
    if n_pad != N:
        x = jnp.pad(x, ((0, n_pad - N), (0, 0)))
    xt = x.T.reshape(F, rows_pad, C)

    # Explicit scoped-VMEM budget: 2 double-buffered x blocks + 2 output blocks
    # plus headroom; stays within v5e's 16 MiB default and v7x's 64 MiB physical.
    block_bytes = 4 * r_blk * C * (F + O)
    vmem_limit = int(min(64 << 20, max(16 << 20, 4 * block_bytes)))

    out = pl.pallas_call(
        linreg_kernel,
        out_shape=jax.ShapeDtypeStruct((O, rows_pad, C), out_dtype),
        grid=(steps,),
        in_specs=[smem, smem,
                  pl.BlockSpec((F, r_blk, C), lambda i: (0, i, 0))],
        out_specs=pl.BlockSpec((O, r_blk, C), lambda i: (0, i, 0)),
        compiler_params=pltpu.CompilerParams(
            dimension_semantics=("parallel",),
            vmem_limit_bytes=vmem_limit),
        cost_estimate=cost,
    )(w_flat, b_flat, xt)

    # [O, rows_pad, C] -> [O, n_pad] -> [O, N] -> [N, O]  (reshape + trim pad).
    return out.reshape(O, n_pad)[:, :N].T


if __name__ == "__main__":
    key = jax.random.PRNGKey(0)
    kx, kw = jax.random.split(key)

    # Shapes implied by the module: x:[N,2], w:[1,2], b:[1,1]
    N, F, O = 8, 2, 1
    x = jax.random.normal(kx, (N, F), dtype=jnp.float32)
    w = jax.random.normal(kw, (O, F), dtype=jnp.float32)   # ~ randn_like(w0)
    b = jnp.full((1, 1), 10.0, dtype=jnp.float32)          # nonzero to exercise bias

    out = linear_regression(x, w, b)
    jax.block_until_ready(out)

    ref = x @ w.T + b
    assert out.shape == (N, O), out.shape
    assert jnp.allclose(out, ref, atol=1e-5, rtol=1e-5), (out, ref)

    # Also exercise the sublane/lane-dense tiled grid path with ragged N
    # (padding + parallel grid + explicit vmem limit).
    N2 = 40000
    x2 = jax.random.normal(kx, (N2, F), dtype=jnp.float32)
    out2 = linear_regression(x2, w, b)
    jax.block_until_ready(out2)
    ref2 = x2 @ w.T + b
    assert out2.shape == (N2, O), out2.shape
    assert jnp.allclose(out2, ref2, atol=1e-5, rtol=1e-5)

    print("KERNEL_OK")
</pallas_src>

<mosaic_0001>
module attributes {stable_mosaic.version = 11 : i64} {
  func.func @linreg_kernel(%arg0: memref<2xf32, #tpu.memory_space<smem>>, %arg1: memref<1xf32, #tpu.memory_space<smem>>, %arg2: memref<2x1x8xf32, #tpu.memory_space<vmem>>, %arg3: memref<1x1x8xf32, #tpu.memory_space<vmem>>) attributes {dimension_semantics = [], scalar_prefetch = 0 : i64, scratch_operands = 0 : i64, tpu.core_type = #tpu.core_type<tc>} {
    %c0 = arith.constant 0 : index
    %0 = memref.load %arg0[%c0] : memref<2xf32, #tpu.memory_space<smem>>
    %c1 = arith.constant 1 : index
    %1 = memref.load %arg0[%c1] : memref<2xf32, #tpu.memory_space<smem>>
    %c0_0 = arith.constant 0 : index
    %2 = memref.load %arg1[%c0_0] : memref<1xf32, #tpu.memory_space<smem>>
    %c0_1 = arith.constant 0 : index
    %c0_2 = arith.constant 0 : index
    %c0_3 = arith.constant 0 : index
    %3 = vector.load %arg2[%c0_1, %c0_2, %c0_3] : memref<2x1x8xf32, #tpu.memory_space<vmem>>, vector<1x1x8xf32>
    %4 = vector.shape_cast %3 : vector<1x1x8xf32> to vector<1x8xf32>
    %5 = vector.broadcast %0 : f32 to vector<1x8xf32>
    %6 = arith.mulf %4, %5 : vector<1x8xf32>
    %7 = vector.broadcast %2 : f32 to vector<1x8xf32>
    %8 = arith.addf %6, %7 : vector<1x8xf32>
    %c1_4 = arith.constant 1 : index
    %c0_5 = arith.constant 0 : index
    %c0_6 = arith.constant 0 : index
    %9 = vector.load %arg2[%c1_4, %c0_5, %c0_6] : memref<2x1x8xf32, #tpu.memory_space<vmem>>, vector<1x1x8xf32>
    %10 = vector.shape_cast %9 : vector<1x1x8xf32> to vector<1x8xf32>
    %11 = vector.broadcast %1 : f32 to vector<1x8xf32>
    %12 = arith.mulf %10, %11 : vector<1x8xf32>
    %13 = arith.addf %8, %12 : vector<1x8xf32>
    %c0_7 = arith.constant 0 : index
    %c0_8 = arith.constant 0 : index
    %c0_9 = arith.constant 0 : index
    %14 = vector.load %arg3[%c0_7, %c0_8, %c0_9] : memref<1x1x8xf32, #tpu.memory_space<vmem>>, vector<1x1x8xf32>
    %15 = vector.shape_cast %14 : vector<1x1x8xf32> to vector<1x8xf32>
    %16 = vector.shape_cast %13 : vector<1x8xf32> to vector<1x1x8xf32>
    tpu.vector_store %arg3[%c0_7, %c0_8, %c0_9], %16 {strides = array<i32>} : memref<1x1x8xf32, #tpu.memory_space<vmem>>, vector<1x1x8xf32>,
    return
  }
}

</mosaic_0001>

<bundles_post_ra>
// kernel: tpu_custom_call.1
= control target key start
LH: loop header
LB: loop body
LE: loop exit
PB: predicated region body
PF: predicated region fallthrough
CT: control target
= control target key end

     0   :  { %9 = vsyncpa [#allocation5], 0  ;;  %s147_s0 = inlined_call_operand.vmem [shape: f32[2], index: 0, kind: input, shape index: {}]   ;;  %s148_s1 = inlined_call_operand.<no memory space> [shape: f32[1], index: 1, kind: input, shape index: {}]   ;;  %s149_s2 = inlined_call_operand.vmem [shape: f32[2,1,8], index: 2, kind: input, shape index: {}]   ;;  %s150_s3 = inlined_call_operand.hbm [shape: f32[1,1,8], index: 3, kind: output, shape index: {}]  }
   0x1   :  { %10 = vsyncpa [#allocation4], 0  ;;  %s17_s14 = sshll.u32 %s147_s0, 4  ;;  %s18_s14 = int_to_ptr.vmem [resolvable:$true] %s17_s14 }
   0x2   :  { %s63_s15 = scalar_lea.vmem %s18_s14, 16  ;;  %p68_p1 = scmp.lt.s32.totalorder %s18_s14, %s18_s14 }
   0x3   :  { %p64_p0 = scmp.ne.s32.totalorder %s18_s14, %s63_s15  ;;  %p69_p2 = scmp.lt.s32.totalorder %s63_s15, %s63_s15 }
   0x5   :  { %p70_p3 = por %p69_p2, %p68_p1 }
   0x7   :  { %p71_p4 = pnand %p70_p3, %p64_p0 }
   0x9   :  { %74 = shalt.err (!%p71_p4)
}
   0xa   :  { %s101_s16 = smov [#allocation3]  }
   0xb   :  { %20 = dma.vmem_to_smem %s18_s14, 16, %s101_s16, [#allocation5]  }
   0xc   :  { %97 = dma.done.wait [#allocation5], 16  }
   0xd   :  { %98 = vsyncadd [#allocation5], 4294967280 }
   0xe   :  { %28 = sfence }
   0xf   :  { %s29_s17 = sld [smem:[#allocation3]]  ;;  %s59_s18 = sld [smem:[#allocation3 + $0x1]]  ;;  %v32_v0 = vld [vmem:[%s149_s2] sm:$0x1]  ;;  %v60_v1 = vld [vmem:[%s149_s2 + $0x1] sm:$0x1]  ;;  %v35_v3 = vstv %s148_s1 }
  0x10   :  { %s102_s24 = smov [#allocation6]   ;;  %vm42_vm0 = vcmask 57344  }
  0x11   :  { %s50_s25 = sshll.u32 %s102_s24, 4  ;;  %s51_s25 = int_to_ptr.vmem [resolvable:$true] %s50_s25 }
  0x12   :  { %s75_s26 = scalar_lea.vmem %s51_s25, 16  ;;  %s79_s27 = scalar_lea.vmem %s51_s25, 32 }
  0x13   :  { %p76_p5 = scmp.ne.s32.totalorder %s51_s25, %s75_s26  ;;  %p80_p6 = scmp.lt.s32.totalorder %s51_s25, %s51_s25 }
  0x14   :  { %p81_p7 = scmp.lt.s32.totalorder %s79_s27, %s75_s26 }
  0x15   :  { %v33_v2 = vstv %s29_s17  ;;  %v39_v4 = vstv %s59_s18 }
  0x16   :  { %v34_v5 = vmul.f32 %v33_v2, %v32_v0  ;;  %v40_v6 = vmul.f32 %v60_v1, %v39_v4  ;;  %p82_p8 = por %p81_p7, %p80_p6 }
  0x18   :  { %v36_v7 = vadd.f32 %v35_v3, %v34_v5  ;;  %p83_p9 = pnand %p82_p8, %p76_p5 }
  0x1a   :  { %v41_v8 = vadd.f32 %v40_v6, %v36_v7 }
  0x1c   :  { %43 = vst.msk [vmem:[#allocation6] sm:$0x1] %vm42_vm0, %v41_v8 }
  0x1d   :  { %86 = shalt.err (!%p83_p9)
}
  0x1e   :  { %s87_s28 = scalar_lea.hbm %s150_s3, 16 }
  0x1f   :  { %p88_p10 = scmp.ne.s32.totalorder %s150_s3, %s87_s28  ;;  %p91_p11 = scmp.lt.u32.totalorder %s87_s28, %s150_s3 }
  0x21   :  { %p93_p12 = pnand %p91_p11, %p88_p10 }
  0x23   :  { %96 = shalt.err (!%p93_p12)
}
  0x24   :  { %53 = dma.vmem_to_hbm [thread:$0]  %s51_s25, 16, %s150_s3, [#allocation4]  }
  0x25   :  { %99 = dma.done.wait [#allocation4], 16  }
  0x26   :  { %100 = vsyncadd [#allocation4], 4294967280 }
  0x27   :  { %57 = vsyncpa [#allocation4], 1 }
  0x28   :  { %58 = vsyncpa [#allocation5], 1 }

</bundles_post_ra>
